<compile_context>
chip_gen: v6e
topology: v6e:2x2x1
jax: 0.10.0
libtpu: 0.0.40
codegen_flags: <defaults>
</compile_context>

<pallas_src>
import jax
import jax.numpy as jnp
from jax.experimental import pallas as pl
from jax.experimental.pallas import tpu as pltpu


def _student_kernel(x_ref,      # VMEM (TB, D)      bf16 : flattened input tile
                    a_ref,      # VMEM (D, K)       bf16 : folded projection A
                    bias_ref,   # VMEM (1, K)       f32  : folded projection bias
                    g_ref,      # VMEM (2K+1, M)    f32  : fused fuzzy matrix
                    w_ref,      # VMEM (M, O_pad)   f32  : rule consequents (lane-padded)
                    out_ref):   # VMEM (TB, O_pad)  f32
    # ---- preprocess_data folded into a single affine projection ----
    #   z = x @ A + bias,  A = components.T / trainVar,
    #   bias = (-(pca_mean @ components.T) - trainMean) / trainVar
    z = jnp.dot(x_ref[...], a_ref[...],
                preferred_element_type=jnp.float32) + bias_ref[...]      # (TB, K)

    # ---- fuzzy layer: fused log-space Gaussian / product t-norm ----
    # d2[b,m] = sum_k (z[b,k]-c[m,k])^2 / sigma[m,k]^2  ==  [z*z | z | 1] @ G
    tb = z.shape[0]
    feats = jnp.concatenate([z * z, z, jnp.ones((tb, 1), jnp.float32)],
                            axis=-1)                                      # (TB, 2K+1)
    d2 = jnp.dot(feats, g_ref[...], preferred_element_type=jnp.float32)   # (TB, M)

    # Robustness: clamp tiny cancellation negatives, shift by the per-row min
    # (exactly cancels in the normalization below; prevents exp underflow -> 0/0).
    d2 = jnp.maximum(d2, 0.0)
    d2 = d2 - jnp.min(d2, axis=-1, keepdims=True)

    fire = jnp.exp(-0.5 * d2)                                             # (TB, M)
    denom = jnp.sum(fire, axis=-1, keepdims=True)                         # (TB, 1)

    # ---- zero-order TSK defuzzification, normalization folded after matmul ----
    out = jnp.dot(fire, w_ref[...], preferred_element_type=jnp.float32)   # (TB, O_pad)
    out_ref[...] = out * pl.reciprocal(denom, approx=True)


def _round_up(x, m):
    return -(-x // m) * m


def student_forward(x_nchw, params, *, block_b=1024):
    """Student forward pass: PCA-affine preprocess + Type-1 Gaussian TSK fuzzy layer."""
    B = x_nchw.shape[0]
    components = jnp.asarray(params["pca_components"], jnp.float32)   # (K, D)
    K, D = components.shape
    centers = jnp.asarray(params["centers"], jnp.float32)             # (M, K)
    sigmas = jnp.asarray(params["sigmas"], jnp.float32)               # (M, K)
    W = jnp.asarray(params["rule_weights"], jnp.float32)              # (M, O)
    M, O = W.shape
    train_mean = jnp.asarray(params["trainMean"], jnp.float32)
    train_var = jnp.asarray(params["trainVar"], jnp.float32)
    pca_mean = jnp.asarray(params["pca_mean"], jnp.float32)           # (D,)

    # ---- host-side parameter folding (plain JAX glue, runs once) ----
    comp_t = components.T                                             # (D, K)
    a_mat = (comp_t / train_var).astype(jnp.bfloat16)                 # (D, K) bf16
    bias = ((-(pca_mean @ comp_t) - train_mean) / train_var
            ).reshape(1, K).astype(jnp.float32)                       # (1, K)

    inv_sig2 = 1.0 / (sigmas * sigmas)                                # (M, K)
    g_mat = jnp.concatenate(
        [inv_sig2.T,                                                  # (K, M)
         (-2.0 * centers * inv_sig2).T,                               # (K, M)
         jnp.sum(centers * centers * inv_sig2, axis=1)[None, :]],     # (1, M)
        axis=0).astype(jnp.float32)                                   # (2K+1, M)

    # Lane-dense consequents / output: pad O up to a multiple of 128.
    O_pad = _round_up(O, 128)
    w_pad = jnp.zeros((M, O_pad), jnp.float32).at[:, :O].set(W)

    # Flatten NCHW -> (B, D) row-major (== torch.flatten(x, start_dim=1)).
    flat = x_nchw.reshape(B, -1).astype(jnp.bfloat16)                 # (B, D)
    assert flat.shape[1] == D, "input does not match PCA components width"

    # Batch tiling. block_b=1024 keeps the double-buffered bf16 x tile + f32
    # output well inside the 32 MiB default scoped VMEM on v5e/v6e/v7x; sweep
    # upward per generation (128 MiB v5e/v6e, 64 MiB v7x; raise vmem_limit_bytes)
    # for very large batches.
    TB = min(block_b, _round_up(B, 8))
    B_pad = _round_up(B, TB)
    if B_pad != B:
        flat = jnp.pad(flat, ((0, B_pad - B), (0, 0)))

    out = pl.pallas_call(
        _student_kernel,
        out_shape=jax.ShapeDtypeStruct((B_pad, O_pad), jnp.float32),
        grid_spec=pltpu.PrefetchScalarGridSpec(
            num_scalar_prefetch=0,
            grid=(B_pad // TB,),
            in_specs=[
                pl.BlockSpec((TB, D), lambda i: (i, 0)),          # x tile (pipelined)
                pl.BlockSpec((D, K), lambda i: (0, 0)),           # A        (resident)
                pl.BlockSpec((1, K), lambda i: (0, 0)),           # bias     (resident)
                pl.BlockSpec((2 * K + 1, M), lambda i: (0, 0)),   # G        (resident)
                pl.BlockSpec((M, O_pad), lambda i: (0, 0)),       # W        (resident)
            ],
            out_specs=pl.BlockSpec((TB, O_pad), lambda i: (i, 0)),
        ),
        compiler_params=pltpu.CompilerParams(
            dimension_semantics=("parallel",)),  # batch tiles shard across v7x's 2 TCs
    )(flat, a_mat, bias, g_mat, w_pad)

    return out[:B, :O]


def student_reference(x_nchw, params):
    """Pure-JAX f32 reference (faithful to the PyTorch math) for correctness."""
    B = x_nchw.shape[0]
    components = params["pca_components"]
    D = components.shape[1]
    flat = x_nchw.reshape(B, D).astype(jnp.float32)
    reduced = (flat - params["pca_mean"][None, :]) @ components.T
    z = (reduced - params["trainMean"]) / params["trainVar"]
    diff = z[:, None, :] - params["centers"][None, :, :]              # (B, M, K)
    mu = jnp.exp(-0.5 * (diff / params["sigmas"][None, :, :]) ** 2)
    fire = jnp.prod(mu, axis=-1)                                      # (B, M)
    fire_n = fire / jnp.sum(fire, axis=-1, keepdims=True)
    return fire_n @ params["rule_weights"]


def make_params(key, n_inputs=5, n_memberships=6, n_outputs=10, data_dim=784):
    ks = jax.random.split(key, 6)
    return {
        # PCA transform parameters (sklearn-style): components_ (K, D), mean_ (D,)
        "pca_components": 0.05 * jax.random.normal(ks[0], (n_inputs, data_dim), jnp.float32),
        "pca_mean": 0.1 * jax.random.normal(ks[1], (data_dim,), jnp.float32),
        # training statistics used by preprocess_data
        "trainMean": jnp.float32(0.1),
        "trainVar": jnp.float32(1.5),
        # fuzzy layer parameters: Gaussian centers / sigmas per (rule, input), consequents
        "centers": jax.random.normal(ks[2], (n_memberships, n_inputs), jnp.float32),
        "sigmas": 0.5 + jnp.abs(jax.random.normal(ks[3], (n_memberships, n_inputs), jnp.float32)),
        "rule_weights": jax.random.normal(ks[4], (n_memberships, n_outputs), jnp.float32),
    }


if __name__ == "__main__":
    key = jax.random.PRNGKey(0)
    k_params, k_x = jax.random.split(key)

    # MNIST-like small batch: NCHW (B=4, C=1, H=28, W=28) -> D=784 (matches evecs [784, 5])
    B, C, H, W = 4, 1, 28, 28
    x = jax.random.normal(k_x, (B, C, H, W), jnp.float32)

    params = make_params(k_params, n_inputs=5, n_memberships=6, n_outputs=10,
                         data_dim=C * H * W)

    out = jax.block_until_ready(student_forward(x, params))
    ref = jax.block_until_ready(student_reference(x, params))

    assert out.shape == (B, 10)
    # Loose-ish tolerance: the kernel uses bf16 projection operands (f32 MXU
    # accumulation) and an EUP approximate reciprocal; the reference is full f32.
    max_err = jnp.max(jnp.abs(out - ref))
    assert jnp.allclose(out, ref, atol=2e-2, rtol=2e-2), f"max abs err = {max_err}"

    print("KERNEL_OK")
</pallas_src>

<mosaic_0001>
module attributes {stable_mosaic.version = 11 : i64} {
  func.func @_student_kernel(%arg0: i32, %arg1: memref<8x784xbf16, #tpu.memory_space<vmem>>, %arg2: memref<784x5xbf16, #tpu.memory_space<vmem>>, %arg3: memref<1x5xf32, #tpu.memory_space<vmem>>, %arg4: memref<11x6xf32, #tpu.memory_space<vmem>>, %arg5: memref<6x128xf32, #tpu.memory_space<vmem>>, %arg6: memref<8x128xf32, #tpu.memory_space<vmem>>) attributes {dimension_semantics = [#tpu.dimension_semantics<parallel>], iteration_bounds = array<i64: 1>, scalar_prefetch = 0 : i64, scratch_operands = 0 : i64, tpu.core_type = #tpu.core_type<tc>, window_params = [{transform_indices = @transform_0, window_bounds = array<i64: 8, 784>}, {pipeline_mode = #tpu.pipeline_mode<synchronous>, transform_indices = @transform_1, window_bounds = array<i64: 784, 5>}, {pipeline_mode = #tpu.pipeline_mode<synchronous>, transform_indices = @transform_2, window_bounds = array<i64: 1, 5>}, {pipeline_mode = #tpu.pipeline_mode<synchronous>, transform_indices = @transform_3, window_bounds = array<i64: 11, 6>}, {pipeline_mode = #tpu.pipeline_mode<synchronous>, transform_indices = @transform_4, window_bounds = array<i64: 6, 128>}, {transform_indices = @transform_5, window_bounds = array<i64: 8, 128>}]} {
    %c0 = arith.constant 0 : index
    %c0_0 = arith.constant 0 : index
    %0 = vector.load %arg1[%c0, %c0_0] : memref<8x784xbf16, #tpu.memory_space<vmem>>, vector<8x784xbf16>
    %c0_1 = arith.constant 0 : index
    %c0_2 = arith.constant 0 : index
    %1 = vector.load %arg2[%c0_1, %c0_2] : memref<784x5xbf16, #tpu.memory_space<vmem>>, vector<784x5xbf16>
    %cst = arith.constant dense<0.000000e+00> : vector<8x5xf32>
    %2 = tpu.matmul %0, %1, %cst {dimension_numbers = #tpu.dot_dimension_numbers<[1], [0], [0], [1], [0, 0, 1, 1], [], []>} : vector<8x784xbf16>, vector<784x5xbf16>, vector<8x5xf32> -> vector<8x5xf32>
    %c0_3 = arith.constant 0 : index
    %c0_4 = arith.constant 0 : index
    %3 = vector.load %arg3[%c0_3, %c0_4] : memref<1x5xf32, #tpu.memory_space<vmem>>, vector<1x5xf32>
    %4 = vector.broadcast %3 : vector<1x5xf32> to vector<8x5xf32>
    %5 = arith.addf %2, %4 : vector<8x5xf32>
    %6 = arith.mulf %5, %5 : vector<8x5xf32>
    %cst_5 = arith.constant 1.000000e+00 : f32
    %7 = vector.broadcast %cst_5 : f32 to vector<8x1xf32>
    %8 = tpu.concatenate %6, %5, %7 in 1 : vector<8x5xf32>, vector<8x5xf32>, vector<8x1xf32> -> vector<8x11xf32>
    %c0_6 = arith.constant 0 : index
    %c0_7 = arith.constant 0 : index
    %9 = vector.load %arg4[%c0_6, %c0_7] : memref<11x6xf32, #tpu.memory_space<vmem>>, vector<11x6xf32>
    %cst_8 = arith.constant dense<0.000000e+00> : vector<8x6xf32>
    %10 = tpu.matmul %8, %9, %cst_8 {dimension_numbers = #tpu.dot_dimension_numbers<[1], [0], [0], [1], [0, 0, 1, 1], [], []>} : vector<8x11xf32>, vector<11x6xf32>, vector<8x6xf32> -> vector<8x6xf32>
    %cst_9 = arith.constant 0.000000e+00 : f32
    %11 = vector.broadcast %cst_9 : f32 to vector<8x6xf32>
    %12 = arith.maximumf %10, %11 : vector<8x6xf32>
    %cst_10 = arith.constant dense<0x7F800000> : vector<8xf32>
    %13 = vector.multi_reduction <minimumf>, %12, %cst_10 [1] : vector<8x6xf32> to vector<8xf32>
    %14 = vector.shape_cast %13 : vector<8xf32> to vector<8x1xf32>
    %15 = vector.broadcast %14 : vector<8x1xf32> to vector<8x6xf32>
    %16 = arith.subf %12, %15 : vector<8x6xf32>
    %cst_11 = arith.constant -5.000000e-01 : f32
    %17 = vector.broadcast %cst_11 : f32 to vector<8x6xf32>
    %18 = arith.mulf %17, %16 : vector<8x6xf32>
    %19 = math.exp %18 : vector<8x6xf32>
    %cst_12 = arith.constant dense<0.000000e+00> : vector<8xf32>
    %20 = vector.multi_reduction <add>, %19, %cst_12 [1] : vector<8x6xf32> to vector<8xf32>
    %21 = vector.shape_cast %20 : vector<8xf32> to vector<8x1xf32>
    %c0_13 = arith.constant 0 : index
    %c0_14 = arith.constant 0 : index
    %22 = vector.load %arg5[%c0_13, %c0_14] : memref<6x128xf32, #tpu.memory_space<vmem>>, vector<6x128xf32>
    %cst_15 = arith.constant dense<0.000000e+00> : vector<8x128xf32>
    %23 = tpu.matmul %19, %22, %cst_15 {dimension_numbers = #tpu.dot_dimension_numbers<[1], [0], [0], [1], [0, 0, 1, 1], [], []>} : vector<8x6xf32>, vector<6x128xf32>, vector<8x128xf32> -> vector<8x128xf32>
    %24 = tpu.reciprocal %21 {approx = true} : vector<8x1xf32> -> vector<8x1xf32>
    %25 = vector.broadcast %24 : vector<8x1xf32> to vector<8x128xf32>
    %26 = arith.mulf %23, %25 : vector<8x128xf32>
    %c0_16 = arith.constant 0 : index
    %c0_17 = arith.constant 0 : index
    %27 = vector.load %arg6[%c0_16, %c0_17] : memref<8x128xf32, #tpu.memory_space<vmem>>, vector<8x128xf32>
    tpu.vector_store %arg6[%c0_16, %c0_17], %26 {strides = array<i32>} : memref<8x128xf32, #tpu.memory_space<vmem>>, vector<8x128xf32>,
    return
  }
  func.func @transform_0(%arg0: i32) -> (i32, i32) {
    %c0_i32 = arith.constant 0 : i32
    %c0_i32_0 = arith.constant 0 : i32
    return %arg0, %c0_i32 : i32, i32
  }
  func.func @transform_1(%arg0: i32) -> (i32, i32) {
    %c0_i32 = arith.constant 0 : i32
    %c0_i32_0 = arith.constant 0 : i32
    %c0_i32_1 = arith.constant 0 : i32
    return %c0_i32, %c0_i32_0 : i32, i32
  }
  func.func @transform_2(%arg0: i32) -> (i32, i32) {
    %c0_i32 = arith.constant 0 : i32
    %c0_i32_0 = arith.constant 0 : i32
    %c0_i32_1 = arith.constant 0 : i32
    return %c0_i32, %c0_i32_0 : i32, i32
  }
  func.func @transform_3(%arg0: i32) -> (i32, i32) {
    %c0_i32 = arith.constant 0 : i32
    %c0_i32_0 = arith.constant 0 : i32
    %c0_i32_1 = arith.constant 0 : i32
    return %c0_i32, %c0_i32_0 : i32, i32
  }
  func.func @transform_4(%arg0: i32) -> (i32, i32) {
    %c0_i32 = arith.constant 0 : i32
    %c0_i32_0 = arith.constant 0 : i32
    %c0_i32_1 = arith.constant 0 : i32
    return %c0_i32, %c0_i32_0 : i32, i32
  }
  func.func @transform_5(%arg0: i32) -> (i32, i32) {
    %c0_i32 = arith.constant 0 : i32
    %c0_i32_0 = arith.constant 0 : i32
    return %arg0, %c0_i32 : i32, i32
  }
}

</mosaic_0001>

<bundles_post_ra>
// kernel: tpu_custom_call.1
= control target key start
LH: loop header
LB: loop body
LE: loop exit
PB: predicated region body
PF: predicated region fallthrough
CT: control target
= control target key end

     0   :  { %v1048_v43 = vmov 0.0   ;;  %vm1049_vm0 = vmmov 0   ;;  %s1266_s0 = inlined_call_operand.vmem [shape: bf16[8,784], index: 0, kind: input, shape index: {}]   ;;  %s1267_s1 = inlined_call_operand.vmem [shape: bf16[784,5], index: 1, kind: input, shape index: {}]   ;;  %s1268_s2 = inlined_call_operand.vmem [shape: f32[1,5], index: 2, kind: input, shape index: {}]   ;;  %s1269_s3 = inlined_call_operand.vmem [shape: f32[11,6], index: 3, kind: input, shape index: {}]   ;;  %s1270_s4 = inlined_call_operand.vmem [shape: f32[6,128], index: 4, kind: input, shape index: {}]   ;;  %s1271_s5 = inlined_call_operand.hbm [shape: f32[8,128], index: 5, kind: output, shape index: {}]  }
   0x1   :  { %v966_v0 = vld [vmem:[%s1267_s1 + $0x78] sm:$0xff]   ;;  %v970_v4 = vld [vmem:[%s1267_s1 + $0x70] sm:$0xff]   ;;  %v974_v8 = vld [vmem:[%s1267_s1 + $0x68] sm:$0xff]  }
   0x2   :  { %v967_v1 = vld [vmem:[%s1267_s1 + $0x38] sm:$0xff]   ;;  %871 = vmatprep.subr.bf16.mxu0 %v966_v0  ;;  %v971_v5 = vld [vmem:[%s1267_s1 + $0x30] sm:$0xff]   ;;  %v975_v9 = vld [vmem:[%s1267_s1 + $0x28] sm:$0xff]  }
   0x3   :  { %v968_v2 = vld [vmem:[%s1267_s1 + $0xf8] sm:$0xff]   ;;  %872 = vmatpush3.bf16.msra.mxu0 %v967_v1  ;;  %v972_v6 = vld [vmem:[%s1267_s1 + $0xf0] sm:$0xff]   ;;  %v976_v10 = vld [vmem:[%s1267_s1 + $0xe8] sm:$0xff]  }
   0x4   :  { %v969_v3 = vld [vmem:[%s1267_s1 + $0xb8] sm:$0xff]   ;;  %893 = vmatprep.subr.bf16.mxu1 %v968_v2  ;;  %873 = vmatprep.subr.bf16.mxu0 %v970_v4  ;;  %v973_v7 = vld [vmem:[%s1267_s1 + $0xb0] sm:$0xff]   ;;  %v977_v11 = vld [vmem:[%s1267_s1 + $0xa8] sm:$0xff]  }
   0x5   :  { %894 = vmatpush3.bf16.msra.mxu1 %v969_v3  ;;  %v978_v12 = vld [vmem:[%s1267_s1 + $0x60] sm:$0xff]   ;;  %v982_v16 = vld [vmem:[%s1267_s1 + $0x58] sm:$0xff]   ;;  %v986_v20 = vld [vmem:[%s1267_s1 + $0x50] sm:$0xff]  }
   0x6   :  { %895 = vmatprep.subr.bf16.mxu1 %v972_v6  ;;  %v979_v13 = vld [vmem:[%s1267_s1 + $0x20] sm:$0xff]   ;;  %v983_v17 = vld [vmem:[%s1267_s1 + $0x18] sm:$0xff]   ;;  %v987_v21 = vld [vmem:[%s1267_s1 + $0x10] sm:$0xff]  }
   0x7   :  { %874 = vmatpush3.bf16.msra.mxu0 %v971_v5  ;;  %v980_v14 = vld [vmem:[%s1267_s1 + $0xe0] sm:$0xff]   ;;  %v984_v18 = vld [vmem:[%s1267_s1 + $0xd8] sm:$0xff]   ;;  %v988_v22 = vld [vmem:[%s1267_s1 + $0xd0] sm:$0xff]  }
   0x8   :  { %875 = vmatprep.subr.bf16.mxu0 %v974_v8  ;;  %v981_v15 = vld [vmem:[%s1267_s1 + $0xa0] sm:$0xff]   ;;  %v985_v19 = vld [vmem:[%s1267_s1 + $0x98] sm:$0xff]   ;;  %v989_v23 = vld [vmem:[%s1267_s1 + $0x90] sm:$0xff]  }
   0x9   :  { %896 = vmatpush3.bf16.msra.mxu1 %v973_v7  ;;  %v990_v24 = vld [vmem:[%s1267_s1 + $0x48] sm:$0xff]   ;;  %v994_v28 = vld [vmem:[%s1267_s1 + $0x40] sm:$0xff]   ;;  %v1000_v35 = vld [vmem:[%s1267_s1 + $0x178] sm:$0xff]  }
   0xa   :  { %897 = vmatprep.subr.bf16.mxu1 %v976_v10  ;;  %v991_v25 = vld [vmem:[%s1267_s1 + $0x8] sm:$0xff]   ;;  %v995_v29 = vld [vmem:[%s1267_s1] sm:$0xff]   ;;  %v1003_v39 = vld [vmem:[%s1267_s1 + $0x138] sm:$0xff]  }
   0xb   :  { %876 = vmatpush3.bf16.msra.mxu0 %v975_v9  ;;  %v992_v26 = vld [vmem:[%s1267_s1 + $0xc8] sm:$0xff]   ;;  %v996_v30 = vld [vmem:[%s1267_s1 + $0xc0] sm:$0xff]   ;;  %v1004_v40 = vld [vmem:[%s1267_s1 + $0x170] sm:$0xff]  }
   0xc   :  { %877 = vmatprep.subr.bf16.mxu0 %v978_v12  ;;  %v993_v27 = vld [vmem:[%s1267_s1 + $0x88] sm:$0xff]   ;;  %v22_v31 = vld [vmem:[%s1266_s0] sm:$0xff]  ;;  %v1005_v41 = vld [vmem:[%s1267_s1 + $0x130] sm:$0xff]  }
   0xd   :  { %898 = vmatpush3.bf16.msra.mxu1 %v977_v11  ;;  %v810_v32 = vcombine.low %v22_v31, %v22_v31  ;;  %v811_v33 = vcombine.high %v22_v31, %v22_v31  ;;  %v999_v34 = vld [vmem:[%s1267_s1 + $0x80] sm:$0xff]   ;;  %v23_v36 = vld [vmem:[%s1266_s0 + $0x8] sm:$0xff]  ;;  %v1010_v47 = vld [vmem:[%s1267_s1 + $0x158] sm:$0xff]  }
   0xe   :  { %899 = vmatprep.subr.bf16.mxu1 %v980_v14  ;;  %v812_v37 = vcombine.low %v23_v36, %v23_v36  ;;  %v813_v38 = vcombine.high %v23_v36, %v23_v36  ;;  %v1006_v42 = vld [vmem:[%s1267_s1 + $0x168] sm:$0xff]   ;;  %v1008_v45 = vld [vmem:[%s1267_s1 + $0x160] sm:$0xff]   ;;  %v1011_v48 = vld [vmem:[%s1267_s1 + $0x118] sm:$0xff]  }
   0xf   :  { %878 = vmatpush3.bf16.msra.mxu0 %v979_v13  ;;  %485 = vmatprep.mubr.bf16.mxu0 %v811_v33  ;;  %v1007_v44 = vld [vmem:[%s1267_s1 + $0x128] sm:$0xff]   ;;  %v1009_v46 = vld [vmem:[%s1267_s1 + $0x120] sm:$0xff]   ;;  %v1012_v49 = vld [vmem:[%s1267_s1 + $0x150] sm:$0xff]  }
  0x10   :  { %879 = vmatprep.subr.bf16.mxu0 %v982_v16  ;;  %525 = vmatprep.mubr.bf16.mxu1 %v813_v38  ;;  %v1018_v50 = vld [vmem:[%s1267_s1 + $0x180] sm:$0xff]   ;;  %v24_v51 = vld [vmem:[%s1266_s0 + $0x10] sm:$0xff]  ;;  %v1021_v53 = vld [vmem:[%s1266_s0 + $0x18] ss:$0 sps:$4 sm:$0xff]  }
  0x11   :  { %900 = vmatpush3.bf16.msra.mxu1 %v981_v15  ;;  %v815_v52 = vcombine.high %v24_v51, %v24_v51 }
  0x12   :  { %901 = vmatprep.subr.bf16.mxu1 %v984_v18 }
  0x13   :  { %880 = vmatpush3.bf16.msra.mxu0 %v983_v17 }
  0x14   :  { %881 = vmatprep.subr.bf16.mxu0 %v986_v20 }
  0x15   :  { %902 = vmatpush3.bf16.msra.mxu1 %v985_v19 }
  0x16   :  { %903 = vmatprep.subr.bf16.mxu1 %v988_v22 }
  0x17   :  { %882 = vmatpush3.bf16.msra.mxu0 %v987_v21 }
  0x18   :  { %883 = vmatprep.subr.bf16.mxu0 %v990_v24 }
  0x19   :  { %904 = vmatpush3.bf16.msra.mxu1 %v989_v23 }
  0x1a   :  { %905 = vmatprep.subr.bf16.mxu1 %v992_v26 }
  0x1b   :  { %884 = vmatpush3.bf16.msra.mxu0 %v991_v25 }
  0x1c   :  { %885 = vmatprep.subr.bf16.mxu0 %v994_v28 }
  0x1d   :  { %906 = vmatpush3.bf16.msra.mxu1 %v993_v27 }
  0x1e   :  { %907 = vmatprep.subr.bf16.mxu1 %v996_v30 }
  0x1f   :  { %886 = vmatpush3.bf16.msra.mxu0 %v995_v29 }
  0x20   :  { %915 = vmatprep.subr.bf16.mxu0 %v1000_v35 }
  0x21   :  { %908 = vmatpush3.bf16.msra.mxu1 %v999_v34 }
  0x22   :  { %486 = vmatmul.mubr.bf16.vlgmr.msra.gmra.mxu0 %v810_v32  ;;  %944 = vmatprep.subr.bf16.mxu1 %v1048_v43 }
  0x23   :  { %916 = vmatpush3.bf16.msra.mxu0 %v1003_v39 }
  0x24   :  { %526 = vmatmul.mubr.bf16.vlgmr.msra.gmra.mxu1 %v812_v37  ;;  %917 = vmatprep.subr.bf16.mxu0 %v1004_v40 }
  0x25   :  { %946 = vmatprep.mubr.msk.bf16.mxu1 %vm1049_vm0, %v1048_v43 }
  0x27   :  { %918 = vmatpush3.bf16.msra.mxu0 %v1005_v41 }
  0x28   :  { %919 = vmatprep.subr.bf16.mxu0 %v1006_v42 }
  0x2b   :  { %920 = vmatpush3.bf16.msra.mxu0 %v1007_v44 }
  0x2c   :  { %921 = vmatprep.subr.bf16.mxu0 %v1008_v45 }
  0x2f   :  { %922 = vmatpush3.bf16.msra.mxu0 %v1009_v46 }
  0x30   :  { %923 = vmatprep.subr.bf16.mxu0 %v1010_v47 }
  0x31   :  { %10 = vsyncpa [#allocation3], 0  ;;  %945 = vmatpush3.bf16.msra.mxu1 %v1018_v50  ;;  %vm449_vm1 = vcmask 130048   ;;  %v1013_v54 = vld [vmem:[%s1267_s1 + $0x110] sm:$0xff]   ;;  %565 = vmatprep.mubr.bf16.mxu0 %v815_v52  ;;  %v1014_v55 = vld [vmem:[%s1267_s1 + $0x148] sm:$0xff]   ;;  %v814_v59 = vcombine.low %v24_v51, %v24_v51  ;;  %vm628_vm2 = vcmask 1042432  }
  0x32   :  { %950 = vmatprep.subr.mxu1 %v1048_v43  ;;  %v1015_v56 = vld [vmem:[%s1267_s1 + $0x108] sm:$0xff]   ;;  %v1016_v57 = vld [vmem:[%s1267_s1 + $0x140] sm:$0xff]   ;;  %s1050_s27 = smov 5   ;;  %vm618_vm3 = vcmask 39936   ;;  %vm620_vm4 = vcmask 80896   ;;  %vm624_vm5 = vcmask 89088  }
  0x33   :  { %924 = vmatpush3.bf16.msra.mxu0 %v1011_v48  ;;  %v1017_v58 = vld [vmem:[%s1267_s1 + $0x100] sm:$0xff]   ;;  %v623_v60 = vld [vmem:[%s1269_s3 + $0x8] sm:$0x7]  ;;  %vm703_vm6 = vcmask 48128   ;;  %vm718_vm7 = vcmask 1045504   ;;  %s1051_s29 = smov [#allocation2]  }
  0x34   :  { %925 = vmatprep.subr.bf16.mxu0 %v1012_v49  ;;  %947 = vmatmul.mubr.msk.bf16.vlgmr.msra.gmra.mxu1 %vm449_vm1, %v1021_v53  ;;  %v622_v61 = vld [vmem:[%s1269_s3] sm:$0xff]  ;;  %s801_s30 = sshll.u32 %s1051_s29, 4  ;;  %s802_s30 = int_to_ptr.vmem [resolvable:$true] %s801_s30 }
  0x35   :  { %954 = vmatprep.mubr.msk.f32.mxu1 %vm1049_vm0, %v1048_v43  ;;  %951 = vmatpush3.msk.msra.mxu1 %vm628_vm2, %v623_v60  ;;  %v809_v11 = vld [vmem:[%s1268_s2] ss:$0 sm:$0xff]  ;;  %p1031_p1 = scmp.lt.s32.totalorder %s802_s30, %s802_s30 }
  0x36   :  { %952 = vmatprep.subr.mxu1 %v1048_v43  ;;  %v714_v30 = vld [vmem:[%s1270_s4] sm:$0x3f]  ;;  %s1026_s4 = scalar_lea.vmem %s802_s30, 128 }
  0x37   :  { %926 = vmatpush3.bf16.msra.mxu0 %v1013_v54  ;;  %953 = vmatpush3.msra.mxu1 %v622_v61  ;;  %p1027_p0 = scmp.ne.s32.totalorder %s802_s30, %s1026_s4  ;;  %p1032_p2 = scmp.lt.s32.totalorder %s1026_s4, %s1026_s4 }
  0x38   :  { %927 = vmatprep.subr.bf16.mxu0 %v1014_v55  ;;  %957 = vmatprep.subr.mxu1 %v1048_v43 }
  0x39   :  { %p1033_p3 = por %p1032_p2, %p1031_p1 }
  0x3b   :  { %928 = vmatpush3.bf16.msra.mxu0 %v1015_v56  ;;  %p1034_p4 = pnand %p1033_p3, %p1027_p0 }
  0x3c   :  { %929 = vmatprep.subr.bf16.mxu0 %v1016_v57 }
  0x3f   :  { %930 = vmatpush3.bf16.msra.mxu0 %v1017_v58 }
  0x42   :  { %566 = vmatmul.mubr.bf16.vlgmr.msra.gmra.mxu0 %v814_v59 }
  0xe2   :  { %v887_v62 = vpop.f32.mrf.mxu0 }
  0xe4   :  { %v888_v63 = vpop.f32.mrf.mxu0  ;;  %v909_v0 = vpop.f32.mrf.mxu1 }
  0xe5   :  { %v889_v10 = vadd.f32 %v888_v63, %v887_v62 }
  0xe6   :  { %v890_v1 = vpop.f32.mrf.mxu0  ;;  %v910_v2 = vpop.f32.mrf.mxu1 }
  0xe7   :  { %v488_v12 = vadd.f32 %v889_v10, %v809_v11  ;;  %v911_v13 = vadd.f32 %v910_v2, %v909_v0 }
  0xe8   :  { %v891_v3 = vpop.f32.mrf.mxu0  ;;  %v912_v4 = vpop.f32.mrf.mxu1 }
  0xe9   :  { %v528_v16 = vadd.f32 %v911_v13, %v488_v12 }
  0xea   :  { %v913_v5 = vpop.f32.mrf.mxu1 }
  0xf4   :  { %v607_v6 = vpop.f32.mrf.mxu1 }
  0xf6   :  { %v948_v7 = vpop.f32.mrf.mxu1 }
  0xf8   :  { %v610_v8 = vpop.f32.mrf.mxu1 }
  0xfa   :  { %v949_v9 = vpop.f32.mrf.mxu1 }
 0x102   :  { %v931_v14 = vpop.f32.mrf.mxu0 }
 0x104   :  { %v932_v15 = vpop.f32.mrf.mxu0 }
 0x105   :  { %v933_v17 = vadd.f32 %v932_v15, %v931_v14 }
 0x106   :  { %v934_v18 = vpop.f32.mrf.mxu0 }
 0x107   :  { %v568_v19 = vadd.f32 %v933_v17, %v528_v16 }
 0x108   :  { %v935_v20 = vpop.f32.mrf.mxu0 }
 0x109   :  { %v608_v21 = vadd.f32 %v607_v6, %v568_v19 }
 0x10b   :  { %615 = vrot.lane.b32.xlu0 %v608_v21, %s1050_s27  ;;  %v613_v22 = vmul.f32 %v608_v21, %v608_v21 }
 0x17d   :  { %v616_v23 = vpop.permute.xlu0 %615 }
 0x17e   :  { %v619_v24 = vsel %vm618_vm3, %v613_v22, %v616_v23 }
 0x17f   :  { %v621_v25 = vsel %vm620_vm4, %v619_v24, 1.0 }
 0x180   :  { %955 = vmatmul.mubr.msk.f32.vlgmr.msra.gmra.mxu1 %vm624_vm5, %v621_v25 }
 0x181   :  { %959 = vmatprep.mubr.msk.f32.mxu1 %vm1049_vm0, %v1048_v43  ;;  %958 = vmatpush3.msk.msra.mxu1 %vm718_vm7, %v714_v30 }
 0x240   :  { %v698_v26 = vpop.f32.mrf.mxu1 }
 0x241   :  { %v702_v27 = vmax.f32 %v698_v26, 0.0 }
 0x242   :  { %v956_v28 = vpop.f32.mrf.mxu1 }
 0x243   :  { %v704_v29 = vsel %vm703_vm6, %v702_v27, inf }
 0x244   :  { %705 = vmin.xlane.f32.xlu0 %v704_v29 }
 0x2cd   :  { %v706_v31 = vpop.xlane.xlu0 %705 }
 0x2ce   :  { %v707_v32 = vsub.f32 %v702_v27, %v706_v31 }
 0x2d0   :  { %v708_v33 = vmul.f32 -0.5, %v707_v32 }
 0x2d2   :  { %v709_v34 = vmul.f32 1.442695, %v708_v33 }
 0x2d4   :  { %1022 = vpow2.f32 %v709_v34 }
 0x2e1   :  { %v1023_v35 = vpop.eup %1022 }
 0x2e2   :  { %960 = vmatmul.mubr.msk.f32.vlgmr.msra.gmra.mxu1 %vm703_vm6, %v1023_v35  ;;  %v711_v36 = vsel %vm703_vm6, %v1023_v35, 0.0 }
 0x2e3   :  { %712 = vadd.xlane.f32.xlu1 %v711_v36 }
 0x36c   :  { %v713_v37 = vpop.xlane.xlu1 %712 }
 0x36d   :  { %1024 = vrcp.f32 %v713_v37 }
 0x37a   :  { %v1025_v38 = vpop.eup %1024 }
 0x3a2   :  { %v788_v39 = vpop.f32.mrf.mxu1 }
 0x3a3   :  { %v793_v40 = vmul.f32 %v1025_v38, %v788_v39 }
 0x3a4   :  { %v961_v41 = vpop.f32.mrf.mxu1 }
 0x3a5   :  { %794 = vst [vmem:[#allocation2] sm:$0xff] %v793_v40 }
 0x3a6   :  { %1037 = shalt.err (!%p1034_p4)
}
 0x3a7   :  { %804 = dma.vmem_to_hbm [thread:$0]  %s802_s30, 128, %s1271_s5, [#allocation3]  }
 0x3a8   :  { %1046 = dma.done.wait [#allocation3], 128  }
 0x3a9   :  { %1047 = vsyncadd [#allocation3], 4294967168 }
 0x3aa   :  { %808 = vsyncpa [#allocation3], 1 }

</bundles_post_ra>
